<compile_context>
chip_gen: v6e
topology: v6e:2x2x1
jax: 0.10.0
libtpu: 0.0.40
codegen_flags: <defaults>
</compile_context>

<pallas_src>
import numpy as np
import jax
import jax.numpy as jnp
from jax.experimental import pallas as pl
from jax.experimental.pallas import tpu as pltpu


# -----------------------------------------------------------------------------
# Host-side, parameter-only preprocessing (exact, float64)
# -----------------------------------------------------------------------------
def _scattered_weight(complex_weight, H, W, kernel_size):
    """Masked-scatter of the complex weight (NO +1): complex [C, H, W//2+1].

    Reproduces torch's `zeros_like(x[0]).masked_scatter(mask, weight)` fill
    order for FourierFilter.get_mask: rows [0..ks//2] then [H-ks//2..H-1],
    cols [0..ks//2], filled row-major per channel.
    """
    cw = np.asarray(complex_weight, dtype=np.float64)        # [C, ks, ks//2+1, 2]
    ks = cw.shape[1]
    Wf = W // 2 + 1
    assert ks < H and ks // 2 + 1 <= Wf, "scatter layout assumes kernel_size < H, W"
    wc = cw[..., 0] + 1j * cw[..., 1]                        # view_as_complex
    rows = np.concatenate([np.arange(ks // 2 + 1), np.arange(H - ks // 2, H)])
    cols = np.arange(ks // 2 + 1)
    scat = np.zeros((cw.shape[0], H, Wf), dtype=np.complex128)
    scat[:, rows[:, None], cols[None, :]] = wc
    return scat


def _channel_operators(gain, H, W):
    """Dense real operators L[c] (HW x HW) such that out_vec = x_vec @ L[c].

    out = irfft2(rfft2(x, norm='ortho') * gain_c, s=(H, W), norm='ortho')
        = (1/(HW)) * Re( conj(F_H) @ (gain_c * (F_H @ x @ F_W)) @ B_W )
    with F_H[u,h] = e^{-2i*pi*u*h/H}, F_W[w,v] = e^{-2i*pi*w*v/W} and
    B_W[v,w'] = mult_v * e^{+2i*pi*v*w'/W}  (mult = 1,2,...,2,1 Hermitian fold;
    imaginary parts of the DC/Nyquist columns drop out, matching irfft).
    Linear in `gain`, so passing the scattered weight (no +1) yields the
    residual/delta operator Lw.
    """
    C, _, Wf = gain.shape
    u = np.arange(H, dtype=np.float64)
    v = np.arange(Wf, dtype=np.float64)
    w = np.arange(W, dtype=np.float64)
    FH = np.exp(-2j * np.pi * np.outer(u, u) / H)            # [u, h] (symmetric)
    FW = np.exp(-2j * np.pi * np.outer(w, v) / W)            # [w, v]
    mult = np.full(Wf, 2.0)
    mult[0] = 1.0
    if W % 2 == 0:
        mult[-1] = 1.0
    BW = mult[:, None] * np.exp(2j * np.pi * np.outer(v, w) / W)   # [v, w']
    # L[c, h, w, h', w'] =
    #   (1/HW) Re( sum_{u,v} conj(FH)[h',u] g[c,u,v] FH[u,h] FW[w,v] BW[v,w'] )
    L = np.einsum('au,cuv,uh,wv,vb->chwab',
                  np.conj(FH), gain, FH, FW, BW, optimize=True)
    L = L.real / float(H * W)
    return L.reshape(C, H * W, H * W)


# -----------------------------------------------------------------------------
# Pallas kernel: residual + lane-dense spectral-delta matmul per channel slab
# -----------------------------------------------------------------------------
def _spectral_residual_kernel(x_ref, lw_ref, o_ref):
    # x_ref: [cpb, B, HW] f32   lw_ref: [cpb, HW, HW] bf16   o_ref: [cpb, B, HW] f32
    cpb = x_ref.shape[0]                       # static (2 channels per step here)
    for c in range(cpb):                       # tiny static unroll
        xc = x_ref[c]                          # [B, HW] f32
        delta = jnp.dot(xc.astype(jnp.bfloat16), lw_ref[c],
                        preferred_element_type=jnp.float32)
        o_ref[c] = xc + delta                  # exact identity path in f32


def fourier_filter(x, complex_weight, kernel_size=7):
    """Pallas TPU forward pass of FourierFilter (NCHW in, float32 out)."""
    B, C, H, W = x.shape
    HW = H * W

    # parameter-only precompute: per-channel folded spectral *delta* operator
    scat = _scattered_weight(complex_weight, H, W, kernel_size)
    Lw = jnp.asarray(_channel_operators(scat, H, W), dtype=jnp.bfloat16)  # [C, HW, HW]

    # lane-dense layout [C, B, HW]: each grid step is full-MXU-width matmuls
    x_cbs = jnp.transpose(x.astype(jnp.float32).reshape(B, C, HW), (1, 0, 2))

    cpb = 2 if (C % 2 == 0 and C >= 2) else 1            # channels per grid step
    grid = (C // cpb,)

    out = pl.pallas_call(
        _spectral_residual_kernel,
        out_shape=jax.ShapeDtypeStruct((C, B, HW), jnp.float32),
        grid=grid,
        in_specs=[
            pl.BlockSpec((cpb, B, HW), lambda g: (g, 0, 0)),    # x slabs, f32
            pl.BlockSpec((cpb, HW, HW), lambda g: (g, 0, 0)),   # delta operators, bf16
        ],
        out_specs=pl.BlockSpec((cpb, B, HW), lambda g: (g, 0, 0)),
        compiler_params=pltpu.CompilerParams(
            dimension_semantics=("parallel",),
            vmem_limit_bytes=32 * 1024 * 1024),
    )(x_cbs, Lw)

    return jnp.transpose(out, (1, 0, 2)).reshape(B, C, H, W)


if __name__ == "__main__":
    key = jax.random.PRNGKey(0)
    k1, k2 = jax.random.split(key)

    B, C, H, W = 2, 4, 16, 16
    kernel_size = 7

    x = jax.random.normal(k1, (B, C, H, W), dtype=jnp.float32)
    # nn.Parameter(torch.randn([dim, ks, ks//2+1, 2]) * 0.2), deterministic here
    complex_weight = 0.2 * jax.random.normal(
        k2, (C, kernel_size, kernel_size // 2 + 1, 2), dtype=jnp.float32)

    y = fourier_filter(x, complex_weight, kernel_size)
    y = jax.block_until_ready(y)

    assert y.shape == (B, C, H, W)
    assert bool(jnp.all(jnp.isfinite(y)))

    # Independent reference: numpy rfft2 / irfft2 pipeline (same semantics as
    # the torch module), float64 on host.
    gain_np = 1.0 + _scattered_weight(complex_weight, H, W, kernel_size)  # [C, H, Wf]
    x_np = np.asarray(x, dtype=np.float64)
    xf = np.fft.rfft2(x_np, norm='ortho')
    ref = np.fft.irfft2(xf * gain_np[None], s=(H, W), norm='ortho')

    y_np = np.asarray(y, dtype=np.float64)
    rel_err = np.linalg.norm(y_np - ref) / np.linalg.norm(ref)
    assert rel_err < 2e-2, f"relative error too large: {rel_err:.3e}"

    print("KERNEL_OK")
</pallas_src>

<mosaic_0001>
module attributes {stable_mosaic.version = 11 : i64} {
  func.func @_spectral_residual_kernel(%arg0: i32, %arg1: memref<2x2x256xf32, #tpu.memory_space<vmem>>, %arg2: memref<2x256x256xbf16, #tpu.memory_space<vmem>>, %arg3: memref<2x2x256xf32, #tpu.memory_space<vmem>>) attributes {dimension_semantics = [#tpu.dimension_semantics<parallel>], iteration_bounds = array<i64: 2>, scalar_prefetch = 0 : i64, scratch_operands = 0 : i64, tpu.core_type = #tpu.core_type<tc>, window_params = [{transform_indices = @transform_0, window_bounds = array<i64: 2, 2, 256>}, {transform_indices = @transform_1, window_bounds = array<i64: 2, 256, 256>}, {transform_indices = @transform_2, window_bounds = array<i64: 2, 2, 256>}]} {
    %c0 = arith.constant 0 : index
    %c0_0 = arith.constant 0 : index
    %c0_1 = arith.constant 0 : index
    %0 = vector.load %arg1[%c0, %c0_0, %c0_1] : memref<2x2x256xf32, #tpu.memory_space<vmem>>, vector<1x2x256xf32>
    %1 = vector.shape_cast %0 : vector<1x2x256xf32> to vector<2x256xf32>
    %2 = arith.truncf %1 : vector<2x256xf32> to vector<2x256xbf16>
    %c0_2 = arith.constant 0 : index
    %c0_3 = arith.constant 0 : index
    %c0_4 = arith.constant 0 : index
    %3 = vector.load %arg2[%c0_2, %c0_3, %c0_4] : memref<2x256x256xbf16, #tpu.memory_space<vmem>>, vector<1x256x256xbf16>
    %4 = vector.shape_cast %3 : vector<1x256x256xbf16> to vector<256x256xbf16>
    %cst = arith.constant dense<0.000000e+00> : vector<2x256xf32>
    %5 = tpu.matmul %2, %4, %cst {dimension_numbers = #tpu.dot_dimension_numbers<[1], [0], [0], [1], [0, 0, 1, 1], [], []>} : vector<2x256xbf16>, vector<256x256xbf16>, vector<2x256xf32> -> vector<2x256xf32>
    %6 = arith.addf %1, %5 : vector<2x256xf32>
    %c0_5 = arith.constant 0 : index
    %c0_6 = arith.constant 0 : index
    %c0_7 = arith.constant 0 : index
    %7 = vector.load %arg3[%c0_5, %c0_6, %c0_7] : memref<2x2x256xf32, #tpu.memory_space<vmem>>, vector<1x2x256xf32>
    %8 = vector.shape_cast %7 : vector<1x2x256xf32> to vector<2x256xf32>
    %9 = vector.shape_cast %6 : vector<2x256xf32> to vector<1x2x256xf32>
    tpu.vector_store %arg3[%c0_5, %c0_6, %c0_7], %9 {strides = array<i32>} : memref<2x2x256xf32, #tpu.memory_space<vmem>>, vector<1x2x256xf32>,
    %c1 = arith.constant 1 : index
    %c0_8 = arith.constant 0 : index
    %c0_9 = arith.constant 0 : index
    %10 = vector.load %arg1[%c1, %c0_8, %c0_9] : memref<2x2x256xf32, #tpu.memory_space<vmem>>, vector<1x2x256xf32>
    %11 = vector.shape_cast %10 : vector<1x2x256xf32> to vector<2x256xf32>
    %12 = arith.truncf %11 : vector<2x256xf32> to vector<2x256xbf16>
    %c1_10 = arith.constant 1 : index
    %c0_11 = arith.constant 0 : index
    %c0_12 = arith.constant 0 : index
    %13 = vector.load %arg2[%c1_10, %c0_11, %c0_12] : memref<2x256x256xbf16, #tpu.memory_space<vmem>>, vector<1x256x256xbf16>
    %14 = vector.shape_cast %13 : vector<1x256x256xbf16> to vector<256x256xbf16>
    %cst_13 = arith.constant dense<0.000000e+00> : vector<2x256xf32>
    %15 = tpu.matmul %12, %14, %cst_13 {dimension_numbers = #tpu.dot_dimension_numbers<[1], [0], [0], [1], [0, 0, 1, 1], [], []>} : vector<2x256xbf16>, vector<256x256xbf16>, vector<2x256xf32> -> vector<2x256xf32>
    %16 = arith.addf %11, %15 : vector<2x256xf32>
    %c1_14 = arith.constant 1 : index
    %c0_15 = arith.constant 0 : index
    %c0_16 = arith.constant 0 : index
    %17 = vector.load %arg3[%c1_14, %c0_15, %c0_16] : memref<2x2x256xf32, #tpu.memory_space<vmem>>, vector<1x2x256xf32>
    %18 = vector.shape_cast %17 : vector<1x2x256xf32> to vector<2x256xf32>
    %19 = vector.shape_cast %16 : vector<2x256xf32> to vector<1x2x256xf32>
    tpu.vector_store %arg3[%c1_14, %c0_15, %c0_16], %19 {strides = array<i32>} : memref<2x2x256xf32, #tpu.memory_space<vmem>>, vector<1x2x256xf32>,
    return
  }
  func.func @transform_0(%arg0: i32) -> (i32, i32, i32) {
    %c0_i32 = arith.constant 0 : i32
    %c0_i32_0 = arith.constant 0 : i32
    %c0_i32_1 = arith.constant 0 : i32
    return %arg0, %c0_i32, %c0_i32_0 : i32, i32, i32
  }
  func.func @transform_1(%arg0: i32) -> (i32, i32, i32) {
    %c0_i32 = arith.constant 0 : i32
    %c0_i32_0 = arith.constant 0 : i32
    %c0_i32_1 = arith.constant 0 : i32
    return %arg0, %c0_i32, %c0_i32_0 : i32, i32, i32
  }
  func.func @transform_2(%arg0: i32) -> (i32, i32, i32) {
    %c0_i32 = arith.constant 0 : i32
    %c0_i32_0 = arith.constant 0 : i32
    %c0_i32_1 = arith.constant 0 : i32
    return %arg0, %c0_i32, %c0_i32_0 : i32, i32, i32
  }
}

</mosaic_0001>

<bundles_post_ra>
// kernel: tpu_custom_call.1
= control target key start
LH: loop header
LB: loop body
LE: loop exit
PB: predicated region body
PF: predicated region fallthrough
CT: control target
= control target key end

     0   :  { %7 = vsyncpa [#allocation3], 0  ;;  %s1568_s0 = inlined_call_operand.hbm [shape: f32[4,2,256], index: 0, kind: input, shape index: {}]   ;;  %s1569_s1 = inlined_call_operand.hbm [shape: bf16[4,256,256], index: 1, kind: input, shape index: {}]   ;;  %s1570_s2 = inlined_call_operand.hbm [shape: f32[4,2,256], index: 2, kind: output, shape index: {}]  }
   0x1   :  { %9 = vsyncpa [#allocation3 + $0x1], 0 }
   0x2   :  { %10 = vsyncpa [#allocation6], 0 }
   0x3   :  { %12 = vsyncpa [#allocation6 + $0x1], 0 }
   0x4   :  { %13 = vsyncpa [#allocation4], 0 }
   0x5   :  { %15 = vsyncpa [#allocation4 + $0x1], 0  ;;  %s1271_s9 = smov 0   ;;  %s1273_s10 = smov 0  }
   0x6   :  { %s1275_s11 = smov 0   ;;  %s1277_s12 = smov 0  }
   0x7 LB: > { %s1292_s13 = sadd.s32 4294967295, %s1244_s12   ;;  %s841_s14 = sadd.s32 4294967294, %s1244_s12   ;;  %s1244_s12 = sphi %s1277_s12, %s1586_s12   ;;  %s1240_s11 = sphi %s1275_s11, %s1585_s11   ;;  %s1236_s10 = sphi %s1273_s10, %s1584_s10   ;;  %s1232_s9 = sphi %s1271_s9, %s1583_s9  }
   0x8   : > { %s1296_s15 = sadd.s32 1, %s1244_s12   ;;  %s28_s16 = sadd.s32 1, %s1240_s11 }
   0x9   : > { %s25_s17 = ssub.s32 %s1244_s12, %s1296_s15  ;;  %p35_p0 = scmp.ne.s32.totalorder %s1240_s11, %s1236_s10 }
   0xa   : > { %p26_p1 = scmp.eq.s32.totalorder %s25_s17, 0  ;;  %p36_p2 = scmp.eq.s32.totalorder %s1244_s12, 0 }
   0xb   : > { %p41_p3 = scmp.ne.s32.totalorder %s1236_s10, %s1232_s9  ;;  %p42_p4 = scmp.eq.s32.totalorder %s1292_s13, 0 }
   0xc   : > { %s1308_s18 = scalar_select %p26_p1, %s1240_s11, %s28_s16  }
   0xd   : > { %p1310_p5 = por %p36_p2, %p35_p0  ;;  %p1314_p6 = por %p42_p4, %p41_p3 }
   0xe   : > { %p91_p7 = scmp.eq.s32.totalorder %s1292_s13, 1  ;;  %p97_p8 = scmp.eq.s32.totalorder %s841_s14, 1 }
   0xf   : > { %s1574_s20 = scalar_select %p1314_p6, 1, 0 }
  0x10   : > { %p983_p10 = scmp.lt.s32.totalorder %s1244_s12, 2  ;;  %p1321_p11 = por %p91_p7, %p35_p0 }
  0x11   : > { %p1325_p12 = por %p97_p8, %p41_p3  ;;  %s1330_s23 = sand.u32 1, %s1240_s11  }
  0x12   : > { %s1575_s21 = scalar_select %p1321_p11, 1, 0 }
  0x13   : > { %s1576_s22 = scalar_select %p1325_p12, 1, 0 }
  0x14   : > { %s961_s24 = sshll.u32 %s1244_s12, 7  ;;  %s844_s25 = sshll.u32 %s1330_s23, 3 }
  0x15   : > { %s1337_s28 = scalar_lea.hbm %s1568_s0, %s961_s24  ;;  %s121_s29 = scalar_lea.vmem [#allocation2], %s844_s25 }
  0x16   : > { %s129_s30 = sshll.u32 %s121_s29, 4  ;;  %p1341_p13 = pnand %p983_p10, %p1310_p5  ;;  %s1345_s30 = int_to_ptr.vmem [resolvable:$true] %s129_s30 }
  0x17   : > { %s118_s4 = scalar_lea.sflag [#allocation3], %s1330_s23  ;;  %s1120_s5 = scalar_lea.hbm %s1337_s28, 128 }
  0x18   : > { %p1121_p0 = scmp.ne.s32.totalorder %s1337_s28, %s1120_s5  ;;  %p1122_p1 = pneg %p1341_p13 }
  0x19   : > { %s1125_s8 = scalar_lea.hbm %s1568_s0, 256  ;;  %p1126_p4 = scmp.lt.s32.totalorder %s1337_s28, %s1568_s0 }
  0x1a   : > { %p1123_p2 = pnand %p1122_p1, %p1121_p0  ;;  %p1127_p5 = scmp.lt.s32.totalorder %s1125_s8, %s1120_s5 }
  0x1c   : > { %p1124_p3 = pneg %p1123_p2  ;;  %p1128_p7 = por %p1127_p5, %p1126_p4 }
  0x1e   : > { %p1129_p8 = pnand %p1128_p7, %p1124_p3 }
  0x20   : > { %1132 = shalt.err (!%p1129_p8)
}
  0x21   : > { %s1133_s17 = scalar_lea.vmem %s1345_s30, 128  ;;  %s1246_s19 = smov [#allocation2]  }
  0x22   : > { %p1134_p10 = scmp.ne.s32.totalorder %s1345_s30, %s1133_s17  ;;  %s1138_s24 = sshll.u32 %s1246_s19, 4  ;;  %s1139_s24 = int_to_ptr.vmem [resolvable:$false] %s1138_s24 }
  0x23   : > { %s1140_s25 = scalar_lea.vmem %s1139_s24, 256  ;;  %p1141_p9 = scmp.lt.s32.totalorder %s1345_s30, %s1139_s24 }
  0x24   : > { %p1136_p0 = pnand %p1134_p10, %p1122_p1  ;;  %p1142_p12 = scmp.lt.s32.totalorder %s1140_s25, %s1133_s17 }
  0x26   : > { %p1137_p2 = pneg %p1136_p0  ;;  %p1143_p11 = por %p1142_p12, %p1141_p9 }
  0x28   : > { %p1144_p4 = pnand %p1143_p11, %p1137_p2 }
  0x2a   : > { %1147 = shalt.err (!%p1144_p4)
}
  0x2b   : > { %s1247_s26 = smov 64   ;;  %s1248_s27 = smov 4  }
  0x2c   : > { %975 = dma.hbm_to_vmem [thread:$0]  (!%p1341_p13), %s1337_s28, 128, %s1345_s30, %s118_s4, %s1247_s26, %s1247_s26, %s1248_s27  }
  0x2d   : > { %p852_p3 = scmp.ge.s32.totalorder %s1244_s12, 1  ;;  %p159_p5 = scmp.lt.s32.totalorder %s1244_s12, 3 }
  0x2e   : > { %s848_s29 = sshll.u32 %s1330_s23, 9  ;;  %s963_s6 = sshll.u32 %s1244_s12, 13 }
  0x2f   : > { %p1377_p9 = pnand %p852_p3, %p159_p5  ;;  %s143_s7 = scalar_lea.vmem [#allocation5], %s848_s29 }
  0x30   : > { %s151_s8 = sshll.u32 %s143_s7, 4  ;;  %s1385_s17 = scalar_lea.hbm %s1569_s1, %s963_s6  ;;  %s1387_s8 = int_to_ptr.vmem [resolvable:$true] %s151_s8 }
  0x31   : > { %s140_s28 = scalar_lea.sflag [#allocation6], %s1330_s23  ;;  %s1148_s30 = scalar_lea.hbm %s1385_s17, 8192 }
  0x32   : > { %p1149_p11 = scmp.ne.s32.totalorder %s1385_s17, %s1148_s30  ;;  %s1153_s24 = scalar_lea.hbm %s1569_s1, 16384 }
  0x33   : > { %p1154_p8 = scmp.lt.s32.totalorder %s1385_s17, %s1569_s1  ;;  %p1155_p10 = scmp.lt.s32.totalorder %s1153_s24, %s1148_s30 }
  0x34   : > { %p1151_p12 = pnand %p1149_p11, %p1122_p1 }
  0x35   : > { %p1156_p0 = por %p1155_p10, %p1154_p8 }
  0x36   : > { %p1152_p7 = pneg %p1151_p12 }
  0x38   : > { %p1157_p2 = pnand %p1156_p0, %p1152_p7 }
  0x3a   : > { %1160 = shalt.err (!%p1157_p2)
}
  0x3b   : > { %s1161_s27 = scalar_lea.vmem %s1387_s8, 8192  ;;  %s1249_s29 = smov [#allocation5]  }
  0x3c   : > { %p1162_p4 = scmp.ne.s32.totalorder %s1387_s8, %s1161_s27  ;;  %s1166_s6 = sshll.u32 %s1249_s29, 4  ;;  %s1167_s6 = int_to_ptr.vmem [resolvable:$false] %s1166_s6 }
  0x3d   : > { %s1168_s7 = scalar_lea.vmem %s1167_s6, 16384  ;;  %p1169_p11 = scmp.lt.s32.totalorder %s1387_s8, %s1167_s6 }
  0x3e   : > { %p1164_p3 = pnand %p1162_p4, %p1122_p1  ;;  %p1170_p12 = scmp.lt.s32.totalorder %s1168_s7, %s1161_s27 }
  0x40   : > { %p1165_p5 = pneg %p1164_p3  ;;  %p1171_p6 = por %p1170_p12, %p1169_p11 }
  0x42   : > { %p1172_p8 = pnand %p1171_p6, %p1165_p5 }
  0x44   : > { %1175 = shalt.err (!%p1172_p8)
}
  0x45   : > { %s1250_s14 = smov 128   ;;  %s1251_s16 = smov 8  }
  0x46   : > { %978 = dma.hbm_to_vmem [thread:$0]  (!%p1341_p13), %s1385_s17, 8192, %s1387_s8, %s140_s28, %s1250_s14, %s1250_s14, %s1251_s16  }
  0x47   : > { %163 = sbr.rel (%p1377_p9) target bundleno = 361 (0x169), region = 28  ;;  %s1417_s30 = sand.u32 (!%p1377_p9), 1, %s1236_s10  }
  0x48   : > { %s853_s4 = sshll.u32 (!%p1377_p9), %s1417_s30, 3  ;;  %s166_s19 = scalar_lea.sflag (!%p1377_p9), [#allocation3], %s1417_s30 }
  0x49   : > { %s1423_s24 = scalar_lea.vmem (!%p1377_p9), [#allocation2], %s853_s4  ;;  %p1579_p6 = scmp.ne.s32.totalorder (!%p1377_p9), %s1574_s20, 0 }
  0x4c   : > { %1219 = dma.done.wait (%p1579_p6), %s166_s19, 128  }
  0x4d   : > { %1221 = vsyncadd (%p1579_p6), %s166_s19, 4294967168  ;;  %s854_s23 = sshll.u32 %s1417_s30, 9  ;;  %s175_s3 = scalar_lea.sflag [#allocation6], %s1417_s30 }
  0x4e   : > { %s1431_s5 = scalar_lea.vmem [#allocation5], %s854_s23 }
  0x4f   : > { %1223 = dma.done.wait (%p1579_p6), %s175_s3, 8192  }
  0x50   : > { %1225 = vsyncadd (%p1579_p6), %s175_s3, 4294959104  ;;  %v1024_v0 = vld [vmem:[%s1431_s5 + $0x74] ss:$8 sps:$4 sm:$0xff]   ;;  %v1028_v2 = vld [vmem:[%s1431_s5 + $0x70] ss:$8 sps:$4 sm:$0xff]   ;;  %v212_v38 = vlaneseq  ;;  %s203_s20 = scalar_lea.vmem [#allocation7], %s853_s4 }
  0x51   : > { %v1026_v1 = vld [vmem:[%s1431_s5 + $0x174] ss:$8 sps:$4 sm:$0xff]   ;;  %413 = vmatprep.subr.bf16.mxu0 %v1024_v0  ;;  %v1029_v3 = vld [vmem:[%s1431_s5 + $0x170] ss:$8 sps:$4 sm:$0xff]   ;;  %v1030_v4 = vld [vmem:[%s1431_s5 + $0x64] ss:$8 sps:$4 sm:$0xff]  }
  0x52   : > { %675 = vmatprep.subr.bf16.mxu1 %v1026_v1  ;;  %414 = vmatpush1.bf16.msra.mxu0 %v1028_v2  ;;  %v1032_v5 = vld [vmem:[%s1431_s5 + $0x164] ss:$8 sps:$4 sm:$0xff]   ;;  %v1034_v6 = vld [vmem:[%s1431_s5 + $0x60] ss:$8 sps:$4 sm:$0xff]   ;;  %v1036_v8 = vld [vmem:[%s1431_s5 + $0x54] ss:$8 sps:$4 sm:$0xff]  }
  0x53   : > { %676 = vmatpush1.bf16.msra.mxu1 %v1029_v3  ;;  %415 = vmatprep.subr.bf16.mxu0 %v1030_v4  ;;  %v1035_v7 = vld [vmem:[%s1431_s5 + $0x160] ss:$8 sps:$4 sm:$0xff]   ;;  %v1038_v9 = vld [vmem:[%s1431_s5 + $0x154] ss:$8 sps:$4 sm:$0xff]   ;;  %v1040_v10 = vld [vmem:[%s1431_s5 + $0x50] ss:$8 sps:$4 sm:$0xff]  }
  0x54   : > { %677 = vmatprep.subr.bf16.mxu1 %v1032_v5  ;;  %v1041_v11 = vld [vmem:[%s1431_s5 + $0x150] ss:$8 sps:$4 sm:$0xff]   ;;  %v1042_v12 = vld [vmem:[%s1431_s5 + $0x44] ss:$8 sps:$4 sm:$0xff]   ;;  %v1046_v14 = vld [vmem:[%s1431_s5 + $0x40] ss:$8 sps:$4 sm:$0xff]  }
  0x55   : > { %v1044_v13 = vld [vmem:[%s1431_s5 + $0x144] ss:$8 sps:$4 sm:$0xff]   ;;  %v1047_v15 = vld [vmem:[%s1431_s5 + $0x140] ss:$8 sps:$4 sm:$0xff]   ;;  %v1048_v16 = vld [vmem:[%s1431_s5 + $0x34] ss:$8 sps:$4 sm:$0xff]  }
  0x56   : > { %416 = vmatpush1.bf16.msra.mxu0 %v1034_v6  ;;  %v1050_v17 = vld [vmem:[%s1431_s5 + $0x134] ss:$8 sps:$4 sm:$0xff]   ;;  %v1052_v18 = vld [vmem:[%s1431_s5 + $0x30] ss:$8 sps:$4 sm:$0xff]   ;;  %v1054_v20 = vld [vmem:[%s1431_s5 + $0x24] ss:$8 sps:$4 sm:$0xff]  }
  0x57   : > { %678 = vmatpush1.bf16.msra.mxu1 %v1035_v7  ;;  %417 = vmatprep.subr.bf16.mxu0 %v1036_v8  ;;  %v1053_v19 = vld [vmem:[%s1431_s5 + $0x130] ss:$8 sps:$4 sm:$0xff]   ;;  %v1056_v21 = vld [vmem:[%s1431_s5 + $0x124] ss:$8 sps:$4 sm:$0xff]   ;;  %v1058_v22 = vld [vmem:[%s1431_s5 + $0x20] ss:$8 sps:$4 sm:$0xff]  }
  0x58   : > { %679 = vmatprep.subr.bf16.mxu1 %v1038_v9  ;;  %v1059_v23 = vld [vmem:[%s1431_s5 + $0x120] ss:$8 sps:$4 sm:$0xff]   ;;  %v1060_v24 = vld [vmem:[%s1431_s5 + $0x14] ss:$8 sps:$4 sm:$0xff]   ;;  %v1064_v26 = vld [vmem:[%s1431_s5 + $0x10] ss:$8 sps:$4 sm:$0xff]  }
  0x59   : > { %v1062_v25 = vld [vmem:[%s1431_s5 + $0x114] ss:$8 sps:$4 sm:$0xff]   ;;  %v1065_v27 = vld [vmem:[%s1431_s5 + $0x110] ss:$8 sps:$4 sm:$0xff]   ;;  %v1066_v28 = vld [vmem:[%s1431_s5 + $0x4] ss:$8 sps:$4 sm:$0xff]  }
  0x5a   : > { %418 = vmatpush1.bf16.msra.mxu0 %v1040_v10  ;;  %v1068_v29 = vld [vmem:[%s1431_s5 + $0x104] ss:$8 sps:$4 sm:$0xff]   ;;  %v1070_v30 = vld [vmem:[%s1431_s5] ss:$8 sps:$4 sm:$0xff]   ;;  %v1072_v32 = vld [vmem:[%s1431_s5 + $0xf4] ss:$8 sps:$4 sm:$0xff]  }
  0x5b   : > { %680 = vmatpush1.bf16.msra.mxu1 %v1041_v11  ;;  %419 = vmatprep.subr.bf16.mxu0 %v1042_v12  ;;  %v1071_v31 = vld [vmem:[%s1431_s5 + $0x100] ss:$8 sps:$4 sm:$0xff]   ;;  %v1074_v33 = vld [vmem:[%s1431_s5 + $0x1f4] ss:$8 sps:$4 sm:$0xff]   ;;  %v1076_v34 = vld [vmem:[%s1431_s5 + $0xf0] ss:$8 sps:$4 sm:$0xff]  }
  0x5c   : > { %681 = vmatprep.subr.bf16.mxu1 %v1044_v13  ;;  %v1077_v35 = vld [vmem:[%s1431_s5 + $0x1f0] ss:$8 sps:$4 sm:$0xff]   ;;  %v1252_v36 = vmov 1983009808   ;;  %v1078_v39 = vld [vmem:[%s1431_s5 + $0xe4] ss:$8 sps:$4 sm:$0xff]  }
  0x5d   : > { %v210_v37 = vunpack.c.l.s4 %v1252_v36  ;;  %v1080_v40 = vld [vmem:[%s1431_s5 + $0x1e4] ss:$8 sps:$4 sm:$0xff]   ;;  %v1082_v41 = vld [vmem:[%s1431_s5 + $0xe0] ss:$8 sps:$4 sm:$0xff]   ;;  %v213_v43 = vshrl.u32 %v212_v38, 7  ;;  %s745_s8 = sshll.u32 %s203_s20, 4  ;;  %s1517_s8 = int_to_ptr.vmem [resolvable:$true] %s745_s8 }
  0x5e   : > { %420 = vmatpush1.bf16.msra.mxu0 %v1046_v14  ;;  %v1083_v44 = vld [vmem:[%s1431_s5 + $0x1e0] ss:$8 sps:$4 sm:$0xff]   ;;  %v1084_v45 = vld [vmem:[%s1431_s5 + $0xd4] ss:$8 sps:$4 sm:$0xff]   ;;  %v1088_v47 = vld [vmem:[%s1431_s5 + $0xd0] ss:$8 sps:$4 sm:$0xff]  }
  0x5f   : > { %682 = vmatpush1.bf16.msra.mxu1 %v1047_v15  ;;  %421 = vmatprep.subr.bf16.mxu0 %v1048_v16  ;;  %v211_v42 = vunpack.c.0.s8 %v210_v37  ;;  %v1086_v46 = vld [vmem:[%s1431_s5 + $0x1d4] ss:$8 sps:$4 sm:$0xff]   ;;  %v1089_v48 = vld [vmem:[%s1431_s5 + $0x1d0] ss:$8 sps:$4 sm:$0xff]   ;;  %v1090_v50 = vld [vmem:[%s1431_s5 + $0xc4] ss:$8 sps:$4 sm:$0xff]  }
  0x60   : > { %683 = vmatprep.subr.bf16.mxu1 %v1050_v17  ;;  %v1092_v51 = vld [vmem:[%s1431_s5 + $0x1c4] ss:$8 sps:$4 sm:$0xff]   ;;  %v1486_v52 = vld [vmem:[%s1423_s24] sm:$0xf]  ;;  %v1491_v54 = vld [vmem:[%s1423_s24 + $0x4] sm:$0xf] }
  0x61   : > { %v1481_v49 = vsub.s32 %v211_v42, %v213_v43  ;;  %v1094_v55 = vld [vmem:[%s1431_s5 + $0xc0] ss:$8 sps:$4 sm:$0xff]   ;;  %v1096_v58 = vld [vmem:[%s1431_s5 + $0xb4] ss:$8 sps:$4 sm:$0xff]   ;;  %v1100_v63 = vld [vmem:[%s1431_s5 + $0xb0] ss:$8 sps:$4 sm:$0xff]  }
  0x62   : > { %422 = vmatpush1.bf16.msra.mxu0 %v1052_v18  ;;  %v1095_v56 = vld [vmem:[%s1431_s5 + $0x1c0] ss:$8 sps:$4 sm:$0xff]   ;;  %v1098_v59 = vld [vmem:[%s1431_s5 + $0x1b4] ss:$8 sps:$4 sm:$0xff]   ;;  %v1101_v0 = vld [vmem:[%s1431_s5 + $0x1b0] ss:$8 sps:$4 sm:$0xff]  }
  0x63   : > { %684 = vmatpush1.bf16.msra.mxu1 %v1053_v19  ;;  %423 = vmatprep.subr.bf16.mxu0 %v1054_v20  ;;  %v215_v53 = vrot.slane %v1486_v52, %v1481_v49  ;;  %v476_v57 = vrot.slane %v1491_v54, %v1481_v49  ;;  %v1102_v2 = vld [vmem:[%s1431_s5 + $0xa4] ss:$8 sps:$4 sm:$0xff]   ;;  %v1106_v4 = vld [vmem:[%s1431_s5 + $0xa0] ss:$8 sps:$4 sm:$0xff]   ;;  %v1108_v6 = vld [vmem:[%s1431_s5 + $0x94] ss:$8 sps:$4 sm:$0xff]  }
  0x64   : > { %685 = vmatprep.subr.bf16.mxu1 %v1056_v21  ;;  %v1104_v3 = vld [vmem:[%s1431_s5 + $0x1a4] ss:$8 sps:$4 sm:$0xff]   ;;  %v1107_v5 = vld [vmem:[%s1431_s5 + $0x1a0] ss:$8 sps:$4 sm:$0xff]   ;;  %v1110_v7 = vld [vmem:[%s1431_s5 + $0x194] ss:$8 sps:$4 sm:$0xff]  }
  0x65   : > { %v216_v60 = vcombine.high %v215_v53, %v215_v53  ;;  %v477_v61 = vcombine.high %v476_v57, %v476_v57  ;;  %v1112_v8 = vld [vmem:[%s1431_s5 + $0x90] ss:$8 sps:$4 sm:$0xff]   ;;  %v1114_v10 = vld [vmem:[%s1431_s5 + $0x84] ss:$8 sps:$4 sm:$0xff]   ;;  %v1118_v12 = vld [vmem:[%s1431_s5 + $0x80] ss:$8 sps:$4 sm:$0xff]   ;;  %v219_v14 = vpack.c.bf16 %v215_v53, %v215_v53  ;;  %v480_v15 = vpack.c.bf16 %v476_v57, %v476_v57 }
  0x66   : > { %424 = vmatpush1.bf16.msra.mxu0 %v1058_v22  ;;  %v1113_v9 = vld [vmem:[%s1431_s5 + $0x190] ss:$8 sps:$4 sm:$0xff]   ;;  %v1116_v11 = vld [vmem:[%s1431_s5 + $0x184] ss:$8 sps:$4 sm:$0xff]   ;;  %v1119_v13 = vld [vmem:[%s1431_s5 + $0x180] ss:$8 sps:$4 sm:$0xff]  }
  0x67   : > { %686 = vmatpush1.bf16.msra.mxu1 %v1059_v23  ;;  %425 = vmatprep.subr.bf16.mxu0 %v1060_v24  ;;  %v220_v62 = vpack.c.bf16 %v216_v60, %v216_v60  ;;  %v481_v1 = vpack.c.bf16 %v477_v61, %v477_v61  ;;  %s965_s17 = sshll.u32 %s1292_s13, 7  ;;  %s731_s13 = scalar_lea.sflag [#allocation4], %s1417_s30 }
  0x68   : > { %687 = vmatprep.subr.bf16.mxu1 %v1062_v25  ;;  %s1523_s26 = scalar_lea.hbm %s1570_s2, %s965_s17  ;;  %s1176_s27 = scalar_lea.vmem %s1517_s8, 128 }
  0x69   : > { %445 = vmatprep.mubr.bf16.mxu0 %v220_v62  ;;  %707 = vmatprep.mubr.bf16.mxu1 %v481_v1  ;;  %p1177_p13 = scmp.ne.s32.totalorder %s1517_s8, %s1176_s27  ;;  %p1580_p1 = scmp.ne.s32.totalorder %s1575_s21, 0 }
  0x6a   : > { %426 = vmatpush1.bf16.msra.mxu0 %v1064_v26  ;;  %s1253_s29 = smov [#allocation7]  }
  0x6b   : > { %688 = vmatpush1.bf16.msra.mxu1 %v1065_v27  ;;  %427 = vmatprep.subr.bf16.mxu0 %v1066_v28  ;;  %p1178_p9 = pnand %p1177_p13, %p1580_p1  ;;  %s1180_s6 = sshll.u32 %s1253_s29, 4  ;;  %s1181_s6 = int_to_ptr.vmem [resolvable:$false] %s1180_s6 }
  0x6c   : > { %689 = vmatprep.subr.bf16.mxu1 %v1068_v29  ;;  %s1182_s7 = scalar_lea.vmem %s1181_s6, 256  ;;  %p1183_p10 = scmp.lt.s32.totalorder %s1517_s8, %s1181_s6 }
  0x6d   : > { %p1179_p7 = pneg %p1178_p9  ;;  %p1184_p0 = scmp.lt.s32.totalorder %s1182_s7, %s1176_s27 }
  0x6e   : > { %428 = vmatpush1.bf16.msra.mxu0 %v1070_v30 }
  0x6f   : > { %690 = vmatpush1.bf16.msra.mxu1 %v1071_v31  ;;  %429 = vmatprep.subr.bf16.mxu0 %v1072_v32  ;;  %p1185_p2 = por %p1184_p0, %p1183_p10 }
  0x70   : > { %691 = vmatprep.subr.bf16.mxu1 %v1074_v33 }
  0x71   : > { %p1186_p4 = pnand %p1185_p2, %p1179_p7 }
  0x72   : > { %430 = vmatpush2.bf16.msra.mxu0 %v1076_v34 }
  0x73   : > { %692 = vmatpush2.bf16.msra.mxu1 %v1077_v35  ;;  %431 = vmatprep.subr.bf16.mxu0 %v1078_v39 }
  0x74   : > { %693 = vmatprep.subr.bf16.mxu1 %v1080_v40 }
  0x76   : > { %432 = vmatpush2.bf16.msra.mxu0 %v1082_v41 }
  0x77   : > { %694 = vmatpush2.bf16.msra.mxu1 %v1083_v44  ;;  %433 = vmatprep.subr.bf16.mxu0 %v1084_v45 }
  0x78   : > { %695 = vmatprep.subr.bf16.mxu1 %v1086_v46 }
  0x7a   : > { %434 = vmatpush2.bf16.msra.mxu0 %v1088_v47 }
  0x7b   : > { %696 = vmatpush2.bf16.msra.mxu1 %v1089_v48  ;;  %435 = vmatprep.subr.bf16.mxu0 %v1090_v50 }
  0x7c   : > { %697 = vmatprep.subr.bf16.mxu1 %v1092_v51 }
  0x7e   : > { %436 = vmatpush2.bf16.msra.mxu0 %v1094_v55 }
  0x7f   : > { %698 = vmatpush2.bf16.msra.mxu1 %v1095_v56  ;;  %437 = vmatprep.subr.bf16.mxu0 %v1096_v58 }
  0x80   : > { %699 = vmatprep.subr.bf16.mxu1 %v1098_v59 }
  0x82   : > { %438 = vmatpush2.bf16.msra.mxu0 %v1100_v63 }
  0x83   : > { %700 = vmatpush2.bf16.msra.mxu1 %v1101_v0  ;;  %439 = vmatprep.subr.bf16.mxu0 %v1102_v2 }
  0x84   : > { %701 = vmatprep.subr.bf16.mxu1 %v1104_v3 }
  0x86   : > { %440 = vmatpush2.bf16.msra.mxu0 %v1106_v4 }
  0x87   : > { %702 = vmatpush2.bf16.msra.mxu1 %v1107_v5  ;;  %441 = vmatprep.subr.bf16.mxu0 %v1108_v6 }
  0x88   : > { %703 = vmatprep.subr.bf16.mxu1 %v1110_v7 }
  0x8a   : > { %442 = vmatpush2.bf16.msra.mxu0 %v1112_v8 }
  0x8b   : > { %704 = vmatpush2.bf16.msra.mxu1 %v1113_v9  ;;  %443 = vmatprep.subr.bf16.mxu0 %v1114_v10 }
  0x8c   : > { %705 = vmatprep.subr.bf16.mxu1 %v1116_v11 }
  0x8e   : > { %444 = vmatpush2.bf16.msra.mxu0 %v1118_v12 }
  0x8f   : > { %706 = vmatpush2.bf16.msra.mxu1 %v1119_v13 }
  0x91   : > { %446 = vmatmul.mubr.bf16.vlgmr.msra.gmra.mxu0 %v219_v14 }
  0x92   : > { %708 = vmatmul.mubr.bf16.vlgmr.msra.gmra.mxu1 %v480_v15 }
 0x151   : > { %v447_v16 = vpop.f32.mrf.mxu0 }
 0x152   : > { %v709_v17 = vpop.f32.mrf.mxu1 }
 0x153   : > { %v449_v18 = vpop.f32.mrf.mxu0 }
 0x154   : > { %v711_v19 = vpop.f32.mrf.mxu1  ;;  %v456_v20 = vcombine.low %v447_v16, %v449_v18 }
 0x155   : > { %v718_v21 = vcombine.low %v709_v17, %v711_v19  ;;  %v451_v22 = vpop.f32.mrf.mxu0 }
 0x156   : > { %v713_v23 = vpop.f32.mrf.mxu1  ;;  %v463_v24 = vrot.slane %v456_v20, %v1481_v49 }
 0x157   : > { %v725_v25 = vrot.slane %v718_v21, %v1481_v49  ;;  %v452_v26 = vpop.f32.mrf.mxu0 }
 0x158   : > { %v714_v27 = vpop.f32.mrf.mxu1  ;;  %v465_v28 = vadd.f32 %v463_v24, %v1486_v52 }
 0x159   : > { %v727_v29 = vadd.f32 %v1491_v54, %v725_v25 }
 0x15a   : > { %466 = vst [vmem:[%s203_s20] sm:$0xf] %v465_v28 }
 0x15b   : > { %953 = vst [vmem:[%s203_s20 + $0x4] sm:$0xf] %v727_v29 }
 0x15c   : > { %1189 = shalt.err (!%p1186_p4)
}
 0x15d   : > { %s1190_s14 = scalar_lea.hbm %s1523_s26, 128  ;;  %s1194_s19 = scalar_lea.hbm %s1570_s2, 256 }
 0x15e   : > { %p1191_p3 = scmp.ne.s32.totalorder %s1523_s26, %s1190_s14  ;;  %p1195_p12 = scmp.lt.s32.totalorder %s1523_s26, %s1570_s2 }
 0x15f   : > { %p1196_p8 = scmp.lt.s32.totalorder %s1194_s19, %s1190_s14 }
 0x160   : > { %p1192_p5 = pnand %p1191_p3, %p1580_p1 }
 0x161   : > { %p1197_p6 = por %p1196_p8, %p1195_p12 }
 0x162   : > { %p1193_p11 = pneg %p1192_p5 }
 0x164   : > { %p1198_p13 = pnand %p1197_p6, %p1193_p11 }
 0x166   : > { %1201 = shalt.err (!%p1198_p13)
}
 0x167   : > { %s1254_s3 = smov 64   ;;  %s1255_s5 = smov 4  }
 0x168   : > { %970 = dma.vmem_to_hbm [thread:$0]  (%p1580_p1), %s1517_s8, 128, %s1523_s26, %s731_s13, %s1254_s3, %s1254_s3, %s1255_s5  }
 0x169 PF: > { %s760_s20 = sand.u32 1, %s1232_s9   ;;  %p1581_p9 = scmp.ne.s32.totalorder %s1576_s22, 0 }
 0x16a   : > { %p1582_p7 = scmp.ge.s32.totalorder %s1244_s12, 2  ;;  %s761_s17 = scalar_lea.sflag [#allocation4], %s760_s20 }
 0x16c   : > { %p980_p10 = pnand %p1582_p7, %p1581_p9 }
 0x16e   : > { %p981_p0 = pneg %p980_p10 }
 0x170   : > { %1227 = dma.done.wait (%p981_p0), %s761_s17, 128  }
 0x171   : > { %1229 = vsyncadd (%p981_p0), %s761_s17, 4294967168  ;;  %p18_p2 = scmp.ge.s32.totalorder %s1296_s15, 4   ;;  %s1583_s9 = smov %s1236_s10 }
 0x172   : > { %s1584_s10 = smov %s1240_s11  ;;  %s1585_s11 = smov %s1308_s18 }
 0x173   : > { %s1586_s12 = smov %s1296_s15  ;;  %20 = sbr.rel (!%p18_p2) target bundleno = 7 (0x7), region = 89 }
 0x178   :  { %766 = vsyncpa [#allocation3], 1 }
 0x179   :  { %768 = vsyncpa [#allocation3 + $0x1], 1 }
 0x17a   :  { %769 = vsyncpa [#allocation6], 1 }
 0x17b   :  { %771 = vsyncpa [#allocation6 + $0x1], 1 }
 0x17c   :  { %772 = vsyncpa [#allocation4], 1 }
 0x17d   :  { %774 = vsyncpa [#allocation4 + $0x1], 1 }

</bundles_post_ra>
